<compile_context>
chip_gen: v6e
topology: v6e:2x2x1
jax: 0.10.0
libtpu: 0.0.40
codegen_flags: <defaults>
</compile_context>

<pallas_src>
import functools

import jax
import jax.numpy as jnp
from jax.experimental import pallas as pl
from jax.experimental.pallas import tpu as pltpu

D_PAD = 128   # lane-dense padded feature dim
O_PAD = 128   # lane-dense padded output dim


def _full(shape):
    """Whole-array BlockSpec (no grid)."""
    return pl.BlockSpec(shape, lambda: (0,) * len(shape))


def _pad_last(x, to):
    return jnp.pad(x, [(0, 0)] * (x.ndim - 1) + [(0, to - x.shape[-1])])


def _pad2(x, r, c):
    return jnp.pad(x, [(0, r - x.shape[0]), (0, c - x.shape[1])])


# --------------------------------------------------------------------------
# Single fused kernel: all conv layers + GraphNorm + ReLU + residual
#                      + mean pooling + prediction head.
#
#   a_ref      [N, N+E]  bf16   degree-normalized [adj | S] (mean aggregation folded in)
#   h0_ref     [N, Dp]   f32    encoded node features (zero-padded to Dp)
#   he_ref     [L, E, Dp] bf16  encoded edge features per layer
#   wt_ref     [L, Dp, Dp] bf16 update_feat weights, already transposed (y = x @ W^T)
#   b/gamma/beta/mscale_ref [L, 1, Dp] f32
#   wp_ref     [Dp, Op]  bf16   predict weights, transposed; bp_ref [1, Op] f32
#   out_ref    [1, Op]   f32
#   x_scr      [N+E, Dp] bf16   VMEM scratch holding concat([h, h_e]) for the fused matmul
# --------------------------------------------------------------------------
def gcn_fused_kernel(a_ref, h0_ref, he_ref, wt_ref, b_ref, gamma_ref, beta_ref,
                     mscale_ref, wp_ref, bp_ref, out_ref, x_scr, *, num_conv):
    n = h0_ref.shape[0]
    a = a_ref[...]                                     # [N, N+E] bf16
    h = h0_ref[...]                                    # [N, Dp]  f32 (resident in vregs/VMEM)

    for l in range(num_conv):                          # static unroll (num_conv is small)
        # one fused MXU matmul: neigh = A_norm @ [h ; h_e]  (mean over incoming (u+e) messages)
        x_scr[:n, :] = h.astype(jnp.bfloat16)
        x_scr[n:, :] = he_ref[l]
        neigh = jnp.dot(a, x_scr[...], preferred_element_type=jnp.float32)   # [N, Dp] f32

        # update_feat: Linear(embed_dim, embed_dim)
        z = jnp.dot((neigh + h).astype(jnp.bfloat16), wt_ref[l],
                    preferred_element_type=jnp.float32) + b_ref[l]

        # GraphNorm ('gn'): per-graph, per-feature statistics in f32
        mean = jnp.mean(z, axis=0, keepdims=True)                            # [1, Dp]
        sub = z - mean * mscale_ref[l]
        var = jnp.mean(sub * sub, axis=0, keepdims=True)
        rst = gamma_ref[l] * sub * jax.lax.rsqrt(var + 1e-6) + beta_ref[l]

        if l != num_conv - 1:                          # activation skipped on last conv layer
            rst = jnp.maximum(rst, 0.0)
        h = rst + h                                    # residual connection

    # AvgPooling over nodes + prediction head (dropout = identity in eval)
    g = jnp.mean(h, axis=0, keepdims=True)                                   # [1, Dp]
    out_ref[...] = (jnp.dot(g.astype(jnp.bfloat16), wp_ref[...],
                            preferred_element_type=jnp.float32) + bp_ref[...])


def gcn_fused(A, h0, he, Wt, b, gamma, beta, mscale, Wp_t, bp):
    L = Wt.shape[0]
    N, Dp = h0.shape
    E = he.shape[1]
    Op = Wp_t.shape[1]
    args = (A, h0, he, Wt, b, gamma, beta, mscale, Wp_t, bp)
    return pl.pallas_call(
        functools.partial(gcn_fused_kernel, num_conv=L),
        out_shape=jax.ShapeDtypeStruct((1, Op), jnp.float32),
        in_specs=[_full(a.shape) for a in args],
        out_specs=_full((1, Op)),
        scratch_shapes=[pltpu.VMEM((N + E, Dp), jnp.bfloat16)],
    )(*args)


# --------------------------------------------------------------------------
# Glue: Atom/Bond encoders (sum of per-column categorical embeddings, OGB-style)
# --------------------------------------------------------------------------
def categorical_encode(feat_int, emb_tables):
    # feat_int: int32 [M, F];  emb_tables: f32 [F, V, D]
    out = jnp.zeros((feat_int.shape[0], emb_tables.shape[-1]), jnp.float32)
    for f in range(emb_tables.shape[0]):
        out = out + jnp.take(emb_tables[f], feat_int[:, f], axis=0)
    return out


@functools.partial(jax.jit, static_argnames=("num_layer",))
def gcn_forward(nfeat, efeat, adj, S, params, num_layer):
    L = num_layer - 1
    O = params["Wp"].shape[0]

    # -- one-time graph operator prep: fold mean-normalization into [adj | S], cast to bf16
    deg = jnp.sum(adj, axis=1, keepdims=True)                          # in-degree [N, 1]
    inv = jnp.where(deg > 0, 1.0 / jnp.maximum(deg, 1.0), 0.0)         # 0-deg nodes -> 0
    A = jnp.concatenate([adj * inv, S * inv], axis=1).astype(jnp.bfloat16)   # [N, N+E]

    # -- hoist all embedding gathers (atom + every layer's bond encoder) before the kernel
    h0 = _pad_last(categorical_encode(nfeat, params["atom_emb"]), D_PAD)                 # [N, Dp]
    he = jnp.stack([_pad_last(categorical_encode(efeat, params["bond_emb"][l]), D_PAD)
                    for l in range(L)]).astype(jnp.bfloat16)                             # [L, E, Dp]

    # -- stacked, pre-transposed, lane-padded parameters (zero pad keeps padded cols exactly 0)
    Wt = jnp.stack([_pad2(params["W"][l].T, D_PAD, D_PAD)
                    for l in range(L)]).astype(jnp.bfloat16)                             # [L, Dp, Dp]
    b = jnp.stack([_pad_last(params["b"][l], D_PAD)[None] for l in range(L)])            # [L, 1, Dp]
    gamma = jnp.stack([_pad_last(params["gamma"][l], D_PAD)[None] for l in range(L)])
    beta = jnp.stack([_pad_last(params["beta"][l], D_PAD)[None] for l in range(L)])
    mscale = jnp.stack([_pad_last(params["mscale"][l], D_PAD)[None] for l in range(L)])
    Wp_t = _pad2(params["Wp"].T, D_PAD, O_PAD).astype(jnp.bfloat16)                      # [Dp, Op]
    bp = _pad_last(params["bp"], O_PAD)[None]                                            # [1, Op]

    out = gcn_fused(A, h0, he, Wt, b, gamma, beta, mscale, Wp_t, bp)
    return out[:, :O]


# --------------------------------------------------------------------------
if __name__ == "__main__":
    N, E, D, O = 16, 32, 32, 8          # nodes, edges, embed_dim, output_dim
    NUM_LAYER = 3                        # => 2 conv layers / 2 bond encoders
    F_N, F_E, V = 3, 2, 10               # node/edge categorical feature columns, vocab

    key = jax.random.PRNGKey(0)
    ks = jax.random.split(key, 16)

    # synthetic graph + features
    nfeat = jax.random.randint(ks[0], (N, F_N), 0, V)
    efeat = jax.random.randint(ks[1], (E, F_E), 0, V)
    src = jax.random.randint(ks[2], (E,), 0, N)
    dst = jax.random.randint(ks[3], (E,), 0, N)
    adj = jnp.zeros((N, N), jnp.float32).at[dst, src].add(1.0)     # adj[dst, src]
    S = jax.nn.one_hot(dst, N, dtype=jnp.float32).T                # [N, E] edge->dst scatter

    # deterministic parameters
    params = {
        "atom_emb": 0.1 * jax.random.normal(ks[4], (F_N, V, D), jnp.float32),
        "bond_emb": [0.1 * jax.random.normal(ks[5 + l], (F_E, V, D), jnp.float32)
                     for l in range(NUM_LAYER - 1)],
        "W": [0.1 * jax.random.normal(ks[8 + l], (D, D), jnp.float32)
              for l in range(NUM_LAYER - 1)],
        "b": [jnp.zeros((D,), jnp.float32) for _ in range(NUM_LAYER - 1)],
        "gamma": [jnp.ones((D,), jnp.float32) for _ in range(NUM_LAYER - 1)],
        "beta": [jnp.zeros((D,), jnp.float32) for _ in range(NUM_LAYER - 1)],
        "mscale": [jnp.ones((D,), jnp.float32) for _ in range(NUM_LAYER - 1)],
        "Wp": 0.1 * jax.random.normal(ks[11], (O, D), jnp.float32),
        "bp": jnp.zeros((O,), jnp.float32),
    }

    pre = gcn_forward(nfeat, efeat, adj, S, params, NUM_LAYER)
    jax.block_until_ready(pre)
    assert pre.shape == (1, O) and pre.dtype == jnp.float32
    print("KERNEL_OK")
</pallas_src>

<mosaic_0001>
module attributes {stable_mosaic.version = 11 : i64} {
  func.func @gcn_fused_kernel(%arg0: memref<16x48xbf16, #tpu.memory_space<vmem>>, %arg1: memref<16x128xf32, #tpu.memory_space<vmem>>, %arg2: memref<2x32x128xbf16, #tpu.memory_space<vmem>>, %arg3: memref<2x128x128xbf16, #tpu.memory_space<vmem>>, %arg4: memref<2x1x128xf32, #tpu.memory_space<vmem>>, %arg5: memref<2x1x128xf32, #tpu.memory_space<vmem>>, %arg6: memref<2x1x128xf32, #tpu.memory_space<vmem>>, %arg7: memref<2x1x128xf32, #tpu.memory_space<vmem>>, %arg8: memref<128x128xbf16, #tpu.memory_space<vmem>>, %arg9: memref<1x128xf32, #tpu.memory_space<vmem>>, %arg10: memref<1x128xf32, #tpu.memory_space<vmem>>, %arg11: memref<48x128xbf16, #tpu.memory_space<vmem>>) attributes {dimension_semantics = [], scalar_prefetch = 0 : i64, scratch_operands = 1 : i64, tpu.core_type = #tpu.core_type<tc>} {
    %c0 = arith.constant 0 : index
    %c0_0 = arith.constant 0 : index
    %0 = vector.load %arg0[%c0, %c0_0] : memref<16x48xbf16, #tpu.memory_space<vmem>>, vector<16x48xbf16>
    %c0_1 = arith.constant 0 : index
    %c0_2 = arith.constant 0 : index
    %1 = vector.load %arg1[%c0_1, %c0_2] : memref<16x128xf32, #tpu.memory_space<vmem>>, vector<16x128xf32>
    %2 = arith.truncf %1 : vector<16x128xf32> to vector<16x128xbf16>
    %c0_3 = arith.constant 0 : index
    %c0_4 = arith.constant 0 : index
    %3 = vector.load %arg11[%c0_3, %c0_4] : memref<48x128xbf16, #tpu.memory_space<vmem>>, vector<16x128xbf16>
    tpu.vector_store %arg11[%c0_3, %c0_4], %2 {strides = array<i32>} : memref<48x128xbf16, #tpu.memory_space<vmem>>, vector<16x128xbf16>,
    %c0_5 = arith.constant 0 : index
    %c0_6 = arith.constant 0 : index
    %c0_7 = arith.constant 0 : index
    %4 = vector.load %arg2[%c0_5, %c0_6, %c0_7] : memref<2x32x128xbf16, #tpu.memory_space<vmem>>, vector<1x32x128xbf16>
    %5 = vector.shape_cast %4 : vector<1x32x128xbf16> to vector<32x128xbf16>
    %c16 = arith.constant 16 : index
    %c0_8 = arith.constant 0 : index
    %6 = vector.load %arg11[%c16, %c0_8] : memref<48x128xbf16, #tpu.memory_space<vmem>>, vector<32x128xbf16>
    tpu.vector_store %arg11[%c16, %c0_8], %5 {strides = array<i32>} : memref<48x128xbf16, #tpu.memory_space<vmem>>, vector<32x128xbf16>,
    %c0_9 = arith.constant 0 : index
    %c0_10 = arith.constant 0 : index
    %7 = vector.load %arg11[%c0_9, %c0_10] : memref<48x128xbf16, #tpu.memory_space<vmem>>, vector<48x128xbf16>
    %cst = arith.constant dense<0.000000e+00> : vector<16x128xf32>
    %8 = tpu.matmul %0, %7, %cst {dimension_numbers = #tpu.dot_dimension_numbers<[1], [0], [0], [1], [0, 0, 1, 1], [], []>} : vector<16x48xbf16>, vector<48x128xbf16>, vector<16x128xf32> -> vector<16x128xf32>
    %9 = arith.addf %8, %1 : vector<16x128xf32>
    %10 = arith.truncf %9 : vector<16x128xf32> to vector<16x128xbf16>
    %c0_11 = arith.constant 0 : index
    %c0_12 = arith.constant 0 : index
    %c0_13 = arith.constant 0 : index
    %11 = vector.load %arg3[%c0_11, %c0_12, %c0_13] : memref<2x128x128xbf16, #tpu.memory_space<vmem>>, vector<1x128x128xbf16>
    %12 = vector.shape_cast %11 : vector<1x128x128xbf16> to vector<128x128xbf16>
    %cst_14 = arith.constant dense<0.000000e+00> : vector<16x128xf32>
    %13 = tpu.matmul %10, %12, %cst_14 {dimension_numbers = #tpu.dot_dimension_numbers<[1], [0], [0], [1], [0, 0, 1, 1], [], []>} : vector<16x128xbf16>, vector<128x128xbf16>, vector<16x128xf32> -> vector<16x128xf32>
    %c0_15 = arith.constant 0 : index
    %c0_16 = arith.constant 0 : index
    %c0_17 = arith.constant 0 : index
    %14 = vector.load %arg4[%c0_15, %c0_16, %c0_17] : memref<2x1x128xf32, #tpu.memory_space<vmem>>, vector<1x1x128xf32>
    %15 = vector.shape_cast %14 : vector<1x1x128xf32> to vector<1x128xf32>
    %16 = vector.broadcast %15 : vector<1x128xf32> to vector<16x128xf32>
    %17 = arith.addf %13, %16 : vector<16x128xf32>
    %cst_18 = arith.constant dense<0.000000e+00> : vector<128xf32>
    %18 = vector.multi_reduction <add>, %17, %cst_18 [0] : vector<16x128xf32> to vector<128xf32>
    %19 = vector.shape_cast %18 : vector<128xf32> to vector<1x128xf32>
    %cst_19 = arith.constant 1.600000e+01 : f32
    %20 = vector.broadcast %cst_19 : f32 to vector<1x128xf32>
    %21 = arith.divf %19, %20 : vector<1x128xf32>
    %c0_20 = arith.constant 0 : index
    %c0_21 = arith.constant 0 : index
    %c0_22 = arith.constant 0 : index
    %22 = vector.load %arg7[%c0_20, %c0_21, %c0_22] : memref<2x1x128xf32, #tpu.memory_space<vmem>>, vector<1x1x128xf32>
    %23 = vector.shape_cast %22 : vector<1x1x128xf32> to vector<1x128xf32>
    %24 = arith.mulf %21, %23 : vector<1x128xf32>
    %25 = vector.broadcast %24 : vector<1x128xf32> to vector<16x128xf32>
    %26 = arith.subf %17, %25 : vector<16x128xf32>
    %27 = arith.mulf %26, %26 : vector<16x128xf32>
    %cst_23 = arith.constant dense<0.000000e+00> : vector<128xf32>
    %28 = vector.multi_reduction <add>, %27, %cst_23 [0] : vector<16x128xf32> to vector<128xf32>
    %29 = vector.shape_cast %28 : vector<128xf32> to vector<1x128xf32>
    %cst_24 = arith.constant 1.600000e+01 : f32
    %30 = vector.broadcast %cst_24 : f32 to vector<1x128xf32>
    %31 = arith.divf %29, %30 : vector<1x128xf32>
    %c0_25 = arith.constant 0 : index
    %c0_26 = arith.constant 0 : index
    %c0_27 = arith.constant 0 : index
    %32 = vector.load %arg5[%c0_25, %c0_26, %c0_27] : memref<2x1x128xf32, #tpu.memory_space<vmem>>, vector<1x1x128xf32>
    %33 = vector.shape_cast %32 : vector<1x1x128xf32> to vector<1x128xf32>
    %34 = vector.broadcast %33 : vector<1x128xf32> to vector<16x128xf32>
    %35 = arith.mulf %34, %26 : vector<16x128xf32>
    %cst_28 = arith.constant 9.99999997E-7 : f32
    %36 = vector.broadcast %cst_28 : f32 to vector<1x128xf32>
    %37 = arith.addf %31, %36 : vector<1x128xf32>
    %38 = math.rsqrt %37 : vector<1x128xf32>
    %39 = vector.broadcast %38 : vector<1x128xf32> to vector<16x128xf32>
    %40 = arith.mulf %35, %39 : vector<16x128xf32>
    %c0_29 = arith.constant 0 : index
    %c0_30 = arith.constant 0 : index
    %c0_31 = arith.constant 0 : index
    %41 = vector.load %arg6[%c0_29, %c0_30, %c0_31] : memref<2x1x128xf32, #tpu.memory_space<vmem>>, vector<1x1x128xf32>
    %42 = vector.shape_cast %41 : vector<1x1x128xf32> to vector<1x128xf32>
    %43 = vector.broadcast %42 : vector<1x128xf32> to vector<16x128xf32>
    %44 = arith.addf %40, %43 : vector<16x128xf32>
    %cst_32 = arith.constant 0.000000e+00 : f32
    %45 = vector.broadcast %cst_32 : f32 to vector<16x128xf32>
    %46 = arith.maximumf %44, %45 : vector<16x128xf32>
    %47 = arith.addf %46, %1 : vector<16x128xf32>
    %48 = arith.truncf %47 : vector<16x128xf32> to vector<16x128xbf16>
    %c0_33 = arith.constant 0 : index
    %c0_34 = arith.constant 0 : index
    %49 = vector.load %arg11[%c0_33, %c0_34] : memref<48x128xbf16, #tpu.memory_space<vmem>>, vector<16x128xbf16>
    tpu.vector_store %arg11[%c0_33, %c0_34], %48 {strides = array<i32>} : memref<48x128xbf16, #tpu.memory_space<vmem>>, vector<16x128xbf16>,
    %c1 = arith.constant 1 : index
    %c0_35 = arith.constant 0 : index
    %c0_36 = arith.constant 0 : index
    %50 = vector.load %arg2[%c1, %c0_35, %c0_36] : memref<2x32x128xbf16, #tpu.memory_space<vmem>>, vector<1x32x128xbf16>
    %51 = vector.shape_cast %50 : vector<1x32x128xbf16> to vector<32x128xbf16>
    %c16_37 = arith.constant 16 : index
    %c0_38 = arith.constant 0 : index
    %52 = vector.load %arg11[%c16_37, %c0_38] : memref<48x128xbf16, #tpu.memory_space<vmem>>, vector<32x128xbf16>
    tpu.vector_store %arg11[%c16_37, %c0_38], %51 {strides = array<i32>} : memref<48x128xbf16, #tpu.memory_space<vmem>>, vector<32x128xbf16>,
    %c0_39 = arith.constant 0 : index
    %c0_40 = arith.constant 0 : index
    %53 = vector.load %arg11[%c0_39, %c0_40] : memref<48x128xbf16, #tpu.memory_space<vmem>>, vector<48x128xbf16>
    %cst_41 = arith.constant dense<0.000000e+00> : vector<16x128xf32>
    %54 = tpu.matmul %0, %53, %cst_41 {dimension_numbers = #tpu.dot_dimension_numbers<[1], [0], [0], [1], [0, 0, 1, 1], [], []>} : vector<16x48xbf16>, vector<48x128xbf16>, vector<16x128xf32> -> vector<16x128xf32>
    %55 = arith.addf %54, %47 : vector<16x128xf32>
    %56 = arith.truncf %55 : vector<16x128xf32> to vector<16x128xbf16>
    %c1_42 = arith.constant 1 : index
    %c0_43 = arith.constant 0 : index
    %c0_44 = arith.constant 0 : index
    %57 = vector.load %arg3[%c1_42, %c0_43, %c0_44] : memref<2x128x128xbf16, #tpu.memory_space<vmem>>, vector<1x128x128xbf16>
    %58 = vector.shape_cast %57 : vector<1x128x128xbf16> to vector<128x128xbf16>
    %cst_45 = arith.constant dense<0.000000e+00> : vector<16x128xf32>
    %59 = tpu.matmul %56, %58, %cst_45 {dimension_numbers = #tpu.dot_dimension_numbers<[1], [0], [0], [1], [0, 0, 1, 1], [], []>} : vector<16x128xbf16>, vector<128x128xbf16>, vector<16x128xf32> -> vector<16x128xf32>
    %c1_46 = arith.constant 1 : index
    %c0_47 = arith.constant 0 : index
    %c0_48 = arith.constant 0 : index
    %60 = vector.load %arg4[%c1_46, %c0_47, %c0_48] : memref<2x1x128xf32, #tpu.memory_space<vmem>>, vector<1x1x128xf32>
    %61 = vector.shape_cast %60 : vector<1x1x128xf32> to vector<1x128xf32>
    %62 = vector.broadcast %61 : vector<1x128xf32> to vector<16x128xf32>
    %63 = arith.addf %59, %62 : vector<16x128xf32>
    %cst_49 = arith.constant dense<0.000000e+00> : vector<128xf32>
    %64 = vector.multi_reduction <add>, %63, %cst_49 [0] : vector<16x128xf32> to vector<128xf32>
    %65 = vector.shape_cast %64 : vector<128xf32> to vector<1x128xf32>
    %cst_50 = arith.constant 1.600000e+01 : f32
    %66 = vector.broadcast %cst_50 : f32 to vector<1x128xf32>
    %67 = arith.divf %65, %66 : vector<1x128xf32>
    %c1_51 = arith.constant 1 : index
    %c0_52 = arith.constant 0 : index
    %c0_53 = arith.constant 0 : index
    %68 = vector.load %arg7[%c1_51, %c0_52, %c0_53] : memref<2x1x128xf32, #tpu.memory_space<vmem>>, vector<1x1x128xf32>
    %69 = vector.shape_cast %68 : vector<1x1x128xf32> to vector<1x128xf32>
    %70 = arith.mulf %67, %69 : vector<1x128xf32>
    %71 = vector.broadcast %70 : vector<1x128xf32> to vector<16x128xf32>
    %72 = arith.subf %63, %71 : vector<16x128xf32>
    %73 = arith.mulf %72, %72 : vector<16x128xf32>
    %cst_54 = arith.constant dense<0.000000e+00> : vector<128xf32>
    %74 = vector.multi_reduction <add>, %73, %cst_54 [0] : vector<16x128xf32> to vector<128xf32>
    %75 = vector.shape_cast %74 : vector<128xf32> to vector<1x128xf32>
    %cst_55 = arith.constant 1.600000e+01 : f32
    %76 = vector.broadcast %cst_55 : f32 to vector<1x128xf32>
    %77 = arith.divf %75, %76 : vector<1x128xf32>
    %c1_56 = arith.constant 1 : index
    %c0_57 = arith.constant 0 : index
    %c0_58 = arith.constant 0 : index
    %78 = vector.load %arg5[%c1_56, %c0_57, %c0_58] : memref<2x1x128xf32, #tpu.memory_space<vmem>>, vector<1x1x128xf32>
    %79 = vector.shape_cast %78 : vector<1x1x128xf32> to vector<1x128xf32>
    %80 = vector.broadcast %79 : vector<1x128xf32> to vector<16x128xf32>
    %81 = arith.mulf %80, %72 : vector<16x128xf32>
    %cst_59 = arith.constant 9.99999997E-7 : f32
    %82 = vector.broadcast %cst_59 : f32 to vector<1x128xf32>
    %83 = arith.addf %77, %82 : vector<1x128xf32>
    %84 = math.rsqrt %83 : vector<1x128xf32>
    %85 = vector.broadcast %84 : vector<1x128xf32> to vector<16x128xf32>
    %86 = arith.mulf %81, %85 : vector<16x128xf32>
    %c1_60 = arith.constant 1 : index
    %c0_61 = arith.constant 0 : index
    %c0_62 = arith.constant 0 : index
    %87 = vector.load %arg6[%c1_60, %c0_61, %c0_62] : memref<2x1x128xf32, #tpu.memory_space<vmem>>, vector<1x1x128xf32>
    %88 = vector.shape_cast %87 : vector<1x1x128xf32> to vector<1x128xf32>
    %89 = vector.broadcast %88 : vector<1x128xf32> to vector<16x128xf32>
    %90 = arith.addf %86, %89 : vector<16x128xf32>
    %91 = arith.addf %90, %47 : vector<16x128xf32>
    %cst_63 = arith.constant dense<0.000000e+00> : vector<128xf32>
    %92 = vector.multi_reduction <add>, %91, %cst_63 [0] : vector<16x128xf32> to vector<128xf32>
    %93 = vector.shape_cast %92 : vector<128xf32> to vector<1x128xf32>
    %cst_64 = arith.constant 1.600000e+01 : f32
    %94 = vector.broadcast %cst_64 : f32 to vector<1x128xf32>
    %95 = arith.divf %93, %94 : vector<1x128xf32>
    %96 = arith.truncf %95 : vector<1x128xf32> to vector<1x128xbf16>
    %c0_65 = arith.constant 0 : index
    %c0_66 = arith.constant 0 : index
    %97 = vector.load %arg8[%c0_65, %c0_66] : memref<128x128xbf16, #tpu.memory_space<vmem>>, vector<128x128xbf16>
    %cst_67 = arith.constant dense<0.000000e+00> : vector<1x128xf32>
    %98 = tpu.matmul %96, %97, %cst_67 {dimension_numbers = #tpu.dot_dimension_numbers<[1], [0], [0], [1], [0, 0, 1, 1], [], []>} : vector<1x128xbf16>, vector<128x128xbf16>, vector<1x128xf32> -> vector<1x128xf32>
    %c0_68 = arith.constant 0 : index
    %c0_69 = arith.constant 0 : index
    %99 = vector.load %arg9[%c0_68, %c0_69] : memref<1x128xf32, #tpu.memory_space<vmem>>, vector<1x128xf32>
    %100 = arith.addf %98, %99 : vector<1x128xf32>
    %c0_70 = arith.constant 0 : index
    %c0_71 = arith.constant 0 : index
    %101 = vector.load %arg10[%c0_70, %c0_71] : memref<1x128xf32, #tpu.memory_space<vmem>>, vector<1x128xf32>
    tpu.vector_store %arg10[%c0_70, %c0_71], %100 {strides = array<i32>} : memref<1x128xf32, #tpu.memory_space<vmem>>, vector<1x128xf32>,
    return
  }
}

</mosaic_0001>

<bundles_post_ra>
// kernel: gcn_forward.1
= control target key start
LH: loop header
LB: loop body
LE: loop exit
PB: predicated region body
PF: predicated region fallthrough
CT: control target
= control target key end

     0   :  { %v936_v2 = vmov 0.0   ;;  %vm937_vm0 = vmmov 0   ;;  %vm88_vm1 = vcmask 392192   ;;  %s1190_s0 = inlined_call_operand.vmem [shape: bf16[16,48], index: 0, kind: input, shape index: {}]   ;;  %s1191_s1 = inlined_call_operand.vmem [shape: f32[16,128], index: 1, kind: input, shape index: {}]   ;;  %s1192_s2 = inlined_call_operand.vmem [shape: bf16[2,32,128], index: 2, kind: input, shape index: {}]   ;;  %s1193_s3 = inlined_call_operand.vmem [shape: bf16[2,128,128], index: 3, kind: input, shape index: {}]   ;;  %s1194_s4 = inlined_call_operand.vmem [shape: f32[2,1,128], index: 4, kind: input, shape index: {}]   ;;  %s1195_s5 = inlined_call_operand.vmem [shape: f32[2,1,128], index: 5, kind: input, shape index: {}]   ;;  %s1196_s6 = inlined_call_operand.vmem [shape: f32[2,1,128], index: 6, kind: input, shape index: {}]   ;;  %s1197_s7 = inlined_call_operand.vmem [shape: f32[2,1,128], index: 7, kind: input, shape index: {}]   ;;  %s1198_s8 = inlined_call_operand.vmem [shape: bf16[128,128], index: 8, kind: input, shape index: {}]   ;;  %s1199_s9 = inlined_call_operand.vmem [shape: f32[1,128], index: 9, kind: input, shape index: {}]   ;;  %s1200_s10 = inlined_call_operand.hbm [shape: f32[1,128], index: 10, kind: output, shape index: {}]  }
   0x1   :  { %v53_v0 = vld [vmem:[%s1192_s2 + $0x8] sm:$0xff]   ;;  %v51_v1 = vld [vmem:[%s1192_s2] sm:$0xff]   ;;  %796 = vmatprep.subr.bf16.mxu0 %v936_v2  ;;  %802 = vmatprep.mubr.msk.bf16.mxu0 %vm937_vm0, %v936_v2  ;;  %v883_v6 = vld [vmem:[%s1193_s3 + $0x38] sm:$0xff]  }
   0x2   :  { %57 = vst [vmem:[#allocation2 + $0x10] sm:$0xff] %v53_v0   ;;  %55 = vst [vmem:[#allocation2 + $0x8] sm:$0xff] %v51_v1   ;;  %v1004_v3 = vld [vmem:[%s1191_s1] sm:$0xff]  ;;  %v1009_v4 = vld [vmem:[%s1191_s1 + $0x8] sm:$0xff]  ;;  %806 = vmatprep.subr.bf16.mxu1 %v936_v2  ;;  %822 = vmatprep.mubr.msk.bf16.mxu1 %vm937_vm0, %v936_v2 }
   0x3   :  { %v754_v5 = vpack.c.bf16 %v1009_v4, %v1004_v3  ;;  %v702_v7 = vld [vmem:[%s1192_s2 + $0x18] sm:$0xff]   ;;  %807 = vmatpush3.bf16.msra.mxu1 %v883_v6  ;;  %v884_v8 = vld [vmem:[%s1193_s3 + $0x30] sm:$0xff]   ;;  %v885_v10 = vld [vmem:[%s1193_s3 + $0x28] sm:$0xff]  }
   0x4   :  { %v700_v9 = vld [vmem:[%s1192_s2 + $0x10] sm:$0xff]   ;;  %808 = vmatprep.subr.bf16.mxu1 %v936_v2  ;;  %v886_v13 = vld [vmem:[%s1193_s3 + $0x20] sm:$0xff]   ;;  %v887_v16 = vld [vmem:[%s1193_s3 + $0x18] sm:$0xff]  }
   0x5   :  { %755 = vst [vmem:[#allocation2] sm:$0xff] %v754_v5   ;;  %v1044_v15 = vld [vmem:[%s1190_s0] sm:$0xff]   ;;  %v888_v17 = vld [vmem:[%s1193_s3 + $0x10] sm:$0xff]  }
   0x7   :  { %809 = vmatpush3.bf16.msra.mxu1 %v884_v8 }
   0x8   :  { %810 = vmatprep.subr.bf16.mxu1 %v936_v2 }
   0x9   :  { %v879_v11 = vld [vmem:[#allocation2 + $0x10] sm:$0xff]   ;;  %v880_v12 = vld [vmem:[#allocation2 + $0x8] sm:$0xff]  }
   0xa   :  { %316 = vst [vmem:[#allocation2 + $0x10] sm:$0xff] %v702_v7   ;;  %797 = vmatpush3.bf16.msra.mxu0 %v879_v11  ;;  %314 = vst [vmem:[#allocation2 + $0x8] sm:$0xff] %v700_v9  }
   0xb   :  { %798 = vmatprep.subr.bf16.mxu0 %v936_v2  ;;  %811 = vmatpush3.bf16.msra.mxu1 %v885_v10 }
   0xc   :  { %v881_v14 = vld [vmem:[#allocation2] sm:$0xff]   ;;  %812 = vmatprep.subr.bf16.mxu1 %v936_v2 }
   0xe   :  { %799 = vmatpush3.bf16.msra.mxu0 %v880_v12 }
   0xf   :  { %800 = vmatprep.subr.bf16.mxu0 %v936_v2  ;;  %813 = vmatpush3.bf16.msra.mxu1 %v886_v13 }
  0x10   :  { %814 = vmatprep.subr.bf16.mxu1 %v936_v2 }
  0x12   :  { %801 = vmatpush3.bf16.msra.mxu0 %v881_v14 }
  0x13   :  { %826 = vmatprep.subr.bf16.mxu0 %v936_v2  ;;  %815 = vmatpush3.bf16.msra.mxu1 %v887_v16 }
  0x14   :  { %816 = vmatprep.subr.bf16.mxu1 %v936_v2 }
  0x15   :  { %803 = vmatmul.mubr.msk.bf16.vlgmr.msra.gmra.mxu0 %vm88_vm1, %v1044_v15 }
  0x16   :  { %832 = vmatprep.mubr.msk.bf16.mxu0 %vm937_vm0, %v936_v2 }
  0x17   :  { %817 = vmatpush3.bf16.msra.mxu1 %v888_v17 }
  0x18   :  { %15 = vsyncpa [#allocation4], 0  ;;  %818 = vmatprep.subr.bf16.mxu1 %v936_v2  ;;  %v889_v18 = vld [vmem:[%s1193_s3 + $0x8] sm:$0xff]   ;;  %v890_v19 = vld [vmem:[%s1193_s3] sm:$0xff]   ;;  %v257_v40 = vlaneseq  ;;  %s938_s18 = smov [#allocation3]  }
  0x19   :  { %v891_v27 = vld [vmem:[#allocation2 + $0x10] sm:$0xff]   ;;  %v892_v28 = vld [vmem:[#allocation2 + $0x8] sm:$0xff]   ;;  %v687_v30 = vld [vmem:[%s1194_s4] ss:$0 sm:$0xff]  ;;  %s672_s19 = sshll.u32 %s938_s18, 4  ;;  %s673_s19 = int_to_ptr.vmem [resolvable:$true] %s672_s19 }
  0x1a   :  { %827 = vmatpush3.bf16.msra.mxu0 %v891_v27  ;;  %v1077_v43 = vshrl.u32 %v257_v40, 7  ;;  %v255_v45 = vld [vmem:[%s1197_s7] sm:$0x1]  ;;  %s914_s20 = scalar_lea.vmem %s673_s19, 16  ;;  %s918_s21 = scalar_lea.vmem %s673_s19, 32 }
  0x1b   :  { %819 = vmatpush3.bf16.msra.mxu1 %v889_v18  ;;  %828 = vmatprep.subr.bf16.mxu0 %v936_v2  ;;  %v696_v63 = vld [vmem:[%s1195_s5] ss:$0 sm:$0xff]  ;;  %v894_v18 = vld [vmem:[%s1193_s3 + $0x78] sm:$0xff]   ;;  %p915_p0 = scmp.ne.s32.totalorder %s673_s19, %s914_s20  ;;  %p919_p1 = scmp.lt.s32.totalorder %s673_s19, %s673_s19 }
  0x1c   :  { %820 = vmatprep.subr.bf16.mxu1 %v936_v2  ;;  %v259_v47 = vsub.s32 0, %v1077_v43  ;;  %v697_v6 = vld [vmem:[%s1196_s6] ss:$0 sm:$0xff]  ;;  %p920_p2 = scmp.lt.s32.totalorder %s918_s21, %s914_s20 }
  0x1e   :  { %829 = vmatpush3.bf16.msra.mxu0 %v892_v28  ;;  %p921_p3 = por %p920_p2, %p919_p1 }
  0x1f   :  { %821 = vmatpush3.bf16.msra.mxu1 %v890_v19  ;;  %830 = vmatprep.subr.bf16.mxu0 %v936_v2  ;;  %v898_v19 = vld [vmem:[%s1193_s3 + $0x58] sm:$0xff]  }
  0x20   :  { %856 = vmatprep.subr.bf16.mxu1 %v936_v2  ;;  %p922_p4 = pnand %p921_p3, %p915_p0 }
  0xd5   :  { %v126_v20 = vpop.f32.mrf.mxu0 }
  0xd6   :  { %v127_v23 = vadd.f32 %v126_v20, %v1004_v3  ;;  %v899_v20 = vld [vmem:[%s1193_s3 + $0x50] sm:$0xff]  }
  0xd7   :  { %v804_v21 = vpop.f32.mrf.mxu0 }
  0xd8   :  { %v900_v21 = vld [vmem:[%s1193_s3 + $0x48] sm:$0xff]  }
  0xd9   :  { %v129_v22 = vpop.f32.mrf.mxu0 }
  0xda   :  { %v130_v24 = vadd.f32 %v129_v22, %v1009_v4  ;;  %v901_v22 = vld [vmem:[%s1193_s3 + $0x40] sm:$0xff]  }
  0xdb   :  { %v805_v25 = vpop.f32.mrf.mxu0 }
  0xdc   :  { %v133_v26 = vpack.c.bf16 %v130_v24, %v127_v23 }
  0xde   :  { %823 = vmatmul.mubr.bf16.vlgmr.msra.gmra.mxu1 %v133_v26 }
  0xdf   :  { %872 = vmatprep.mubr.msk.bf16.mxu1 %vm937_vm0, %v936_v2 }
 0x19e   :  { %v239_v29 = vpop.f32.mrf.mxu1 }
 0x19f   :  { %v240_v33 = vadd.f32 %v687_v30, %v239_v29 }
 0x1a0   :  { %v824_v31 = vpop.f32.mrf.mxu1 }
 0x1a1   :  { %v903_v31 = vld [vmem:[%s1198_s8 + $0x30] sm:$0xff]  }
 0x1a2   :  { %v242_v32 = vpop.f32.mrf.mxu1 }
 0x1a3   :  { %v243_v34 = vadd.f32 %v687_v30, %v242_v32  ;;  %v902_v30 = vld [vmem:[%s1198_s8 + $0x38] sm:$0xff]   ;;  %v904_v32 = vld [vmem:[%s1198_s8 + $0x28] sm:$0xff]  }
 0x1a4   :  { %v825_v35 = vpop.f32.mrf.mxu1  ;;  %857 = vmatpush3.bf16.msra.mxu1 %v902_v30 }
 0x1a5   :  { %v246_v36 = vadd.f32 %v243_v34, %v240_v33  ;;  %858 = vmatprep.subr.bf16.mxu1 %v936_v2  ;;  %v907_v35 = vld [vmem:[%s1198_s8 + $0x10] sm:$0xff]  }
 0x1a7   :  { %v247_v37 = vrot.slane %v246_v36, 4 }
 0x1a8   :  { %859 = vmatpush3.bf16.msra.mxu1 %v903_v31 }
 0x1a9   :  { %v248_v38 = vadd.f32 %v247_v37, %v246_v36  ;;  %860 = vmatprep.subr.bf16.mxu1 %v936_v2  ;;  %v908_v36 = vld [vmem:[%s1198_s8 + $0x8] sm:$0xff]   ;;  %v909_v37 = vld [vmem:[%s1198_s8] sm:$0xff]  }
 0x1ab   :  { %v249_v39 = vrot.slane %v248_v38, 2 }
 0x1ac   :  { %861 = vmatpush3.bf16.msra.mxu1 %v904_v32 }
 0x1ad   :  { %v250_v41 = vadd.f32 %v249_v39, %v248_v38  ;;  %862 = vmatprep.subr.bf16.mxu1 %v936_v2  ;;  %v725_v39 = vld [vmem:[%s1194_s4 + $0x1] ss:$0 sm:$0xff] }
 0x1af   :  { %v251_v42 = vrot.slane %v250_v41, 1 }
 0x1b1   :  { %v252_v44 = vadd.f32 %v251_v42, %v250_v41 }
 0x1b3   :  { %v254_v46 = vmul.f32 0.0625, %v252_v44 }
 0x1b5   :  { %v256_v48 = vmul.f32 %v255_v45, %v254_v46 }
 0x1b7   :  { %v260_v49 = vrot.slane %v256_v48, %v259_v47 }
 0x1b9   :  { %v261_v50 = vsub.f32 %v240_v33, %v260_v49  ;;  %v262_v51 = vsub.f32 %v243_v34, %v260_v49  ;;  %v905_v33 = vld [vmem:[%s1198_s8 + $0x20] sm:$0xff]   ;;  %v906_v34 = vld [vmem:[%s1198_s8 + $0x18] sm:$0xff]  }
 0x1ba   :  { %863 = vmatpush3.bf16.msra.mxu1 %v905_v33 }
 0x1bb   :  { %v263_v52 = vmul.f32 %v261_v50, %v261_v50  ;;  %v264_v53 = vmul.f32 %v262_v51, %v262_v51  ;;  %v280_v0 = vmul.f32 %v696_v63, %v261_v50  ;;  %v281_v1 = vmul.f32 %v696_v63, %v262_v51  ;;  %864 = vmatprep.subr.bf16.mxu1 %v936_v2 }
 0x1bd   :  { %v265_v54 = vadd.f32 %v264_v53, %v263_v52 }
 0x1be   :  { %865 = vmatpush3.bf16.msra.mxu1 %v906_v34 }
 0x1bf   :  { %v266_v55 = vrot.slane %v265_v54, 4  ;;  %866 = vmatprep.subr.bf16.mxu1 %v936_v2 }
 0x1c1   :  { %v267_v56 = vadd.f32 %v266_v55, %v265_v54 }
 0x1c2   :  { %867 = vmatpush3.bf16.msra.mxu1 %v907_v35 }
 0x1c3   :  { %v268_v57 = vrot.slane %v267_v56, 2  ;;  %868 = vmatprep.subr.bf16.mxu1 %v936_v2 }
 0x1c5   :  { %v269_v58 = vadd.f32 %v268_v57, %v267_v56 }
 0x1c6   :  { %869 = vmatpush3.bf16.msra.mxu1 %v908_v36 }
 0x1c7   :  { %v270_v59 = vrot.slane %v269_v58, 1  ;;  %870 = vmatprep.subr.bf16.mxu1 %v936_v2 }
 0x1c9   :  { %v271_v60 = vadd.f32 %v270_v59, %v269_v58 }
 0x1ca   :  { %871 = vmatpush3.bf16.msra.mxu1 %v909_v37 }
 0x1cb   :  { %v272_v61 = vmul.f32 0.0625, %v271_v60 }
 0x1cd   :  { %v282_v62 = vadd.f32 1e-06, %v272_v61 }
 0x1cf   :  { %910 = vrsqrt.f32 %v282_v62 }
 0x1dc   :  { %v911_v5 = vpop.eup %910 }
 0x1dd   :  { %v284_v7 = vmul.f32 %v911_v5, %v280_v0  ;;  %v285_v8 = vmul.f32 %v911_v5, %v281_v1 }
 0x1df   :  { %v293_v9 = vadd.f32 %v697_v6, %v284_v7  ;;  %v294_v10 = vadd.f32 %v697_v6, %v285_v8 }
 0x1e1   :  { %v295_v11 = vmax.f32 %v293_v9, 0.0  ;;  %v296_v12 = vmax.f32 %v294_v10, 0.0  ;;  %v736_v9 = vld [vmem:[%s1195_s5 + $0x1] ss:$0 sm:$0xff] }
 0x1e3   :  { %v1092_v13 = vadd.f32 %v295_v11, %v1004_v3  ;;  %v1095_v14 = vadd.f32 %v296_v12, %v1009_v4  ;;  %v895_v3 = vld [vmem:[%s1193_s3 + $0x70] sm:$0xff]   ;;  %v896_v4 = vld [vmem:[%s1193_s3 + $0x68] sm:$0xff]   ;;  %v738_v11 = vld [vmem:[%s1196_s6 + $0x1] ss:$0 sm:$0xff] }
 0x1e5   :  { %v759_v16 = vpack.c.bf16 %v1095_v14, %v1092_v13 }
 0x1e7   :  { %760 = vst [vmem:[#allocation2] sm:$0xff] %v759_v16  }
 0x1ee   :  { %v893_v17 = vld [vmem:[#allocation2] sm:$0xff]  }
 0x1ef   :  { %831 = vmatpush3.bf16.msra.mxu0 %v893_v17 }
 0x1f0   :  { %836 = vmatprep.subr.bf16.mxu0 %v936_v2 }
 0x1f2   :  { %833 = vmatmul.mubr.msk.bf16.vlgmr.msra.gmra.mxu0 %vm88_vm1, %v1044_v15  ;;  %v897_v15 = vld [vmem:[%s1193_s3 + $0x60] sm:$0xff]  }
 0x1f3   :  { %837 = vmatpush3.bf16.msra.mxu0 %v894_v18  ;;  %852 = vmatprep.mubr.msk.bf16.mxu0 %vm937_vm0, %v936_v2 }
 0x1f4   :  { %838 = vmatprep.subr.bf16.mxu0 %v936_v2 }
 0x1f7   :  { %839 = vmatpush3.bf16.msra.mxu0 %v895_v3 }
 0x1f8   :  { %840 = vmatprep.subr.bf16.mxu0 %v936_v2 }
 0x1fb   :  { %841 = vmatpush3.bf16.msra.mxu0 %v896_v4 }
 0x1fc   :  { %842 = vmatprep.subr.bf16.mxu0 %v936_v2 }
 0x1ff   :  { %843 = vmatpush3.bf16.msra.mxu0 %v897_v15 }
 0x200   :  { %844 = vmatprep.subr.bf16.mxu0 %v936_v2 }
 0x203   :  { %845 = vmatpush3.bf16.msra.mxu0 %v898_v19 }
 0x204   :  { %846 = vmatprep.subr.bf16.mxu0 %v936_v2 }
 0x207   :  { %847 = vmatpush3.bf16.msra.mxu0 %v899_v20 }
 0x208   :  { %848 = vmatprep.subr.bf16.mxu0 %v936_v2 }
 0x20b   :  { %849 = vmatpush3.bf16.msra.mxu0 %v900_v21 }
 0x20c   :  { %850 = vmatprep.subr.bf16.mxu0 %v936_v2  ;;  %v734_v2 = vld [vmem:[%s1197_s7 + $0x1] sm:$0x1] }
 0x20f   :  { %851 = vmatpush3.bf16.msra.mxu0 %v901_v22 }
 0x2b2   :  { %v376_v23 = vpop.f32.mrf.mxu0 }
 0x2b3   :  { %v377_v26 = vadd.f32 %v376_v23, %v1092_v13 }
 0x2b4   :  { %v834_v24 = vpop.f32.mrf.mxu0 }
 0x2b6   :  { %v379_v25 = vpop.f32.mrf.mxu0 }
 0x2b7   :  { %v380_v27 = vadd.f32 %v379_v25, %v1095_v14 }
 0x2b8   :  { %v835_v28 = vpop.f32.mrf.mxu0 }
 0x2b9   :  { %v383_v29 = vpack.c.bf16 %v380_v27, %v377_v26  ;;  %v576_v27 = vld [vmem:[%s1199_s9] sm:$0x1] }
 0x2bb   :  { %853 = vmatmul.mubr.bf16.vlgmr.msra.gmra.mxu0 %v383_v29 }
 0x37b   :  { %v491_v38 = vpop.f32.mrf.mxu0 }
 0x37c   :  { %v492_v42 = vadd.f32 %v725_v39, %v491_v38 }
 0x37d   :  { %v854_v40 = vpop.f32.mrf.mxu0 }
 0x37f   :  { %v494_v41 = vpop.f32.mrf.mxu0 }
 0x380   :  { %v495_v44 = vadd.f32 %v725_v39, %v494_v41 }
 0x381   :  { %v855_v45 = vpop.f32.mrf.mxu0 }
 0x382   :  { %v498_v46 = vadd.f32 %v495_v44, %v492_v42 }
 0x384   :  { %v499_v48 = vrot.slane %v498_v46, 4 }
 0x386   :  { %v500_v49 = vadd.f32 %v499_v48, %v498_v46 }
 0x388   :  { %v501_v50 = vrot.slane %v500_v49, 2 }
 0x38a   :  { %v502_v51 = vadd.f32 %v501_v50, %v500_v49 }
 0x38c   :  { %v503_v52 = vrot.slane %v502_v51, 1 }
 0x38e   :  { %v504_v53 = vadd.f32 %v503_v52, %v502_v51 }
 0x390   :  { %v505_v54 = vmul.f32 0.0625, %v504_v53 }
 0x392   :  { %v508_v55 = vmul.f32 %v734_v2, %v505_v54 }
 0x394   :  { %v512_v56 = vrot.slane %v508_v55, %v259_v47 }
 0x396   :  { %v513_v57 = vsub.f32 %v492_v42, %v512_v56  ;;  %v514_v58 = vsub.f32 %v495_v44, %v512_v56 }
 0x398   :  { %v515_v59 = vmul.f32 %v513_v57, %v513_v57  ;;  %v516_v60 = vmul.f32 %v514_v58, %v514_v58  ;;  %v533_v43 = vmul.f32 %v736_v9, %v513_v57  ;;  %v534_v47 = vmul.f32 %v736_v9, %v514_v58 }
 0x39a   :  { %v517_v61 = vadd.f32 %v516_v60, %v515_v59 }
 0x39c   :  { %v518_v62 = vrot.slane %v517_v61, 4 }
 0x39e   :  { %v519_v63 = vadd.f32 %v518_v62, %v517_v61 }
 0x3a0   :  { %v520_v0 = vrot.slane %v519_v63, 2 }
 0x3a2   :  { %v521_v1 = vadd.f32 %v520_v0, %v519_v63 }
 0x3a4   :  { %v522_v5 = vrot.slane %v521_v1, 1 }
 0x3a6   :  { %v523_v6 = vadd.f32 %v522_v5, %v521_v1 }
 0x3a8   :  { %v524_v7 = vmul.f32 0.0625, %v523_v6 }
 0x3aa   :  { %v535_v8 = vadd.f32 1e-06, %v524_v7 }
 0x3ac   :  { %912 = vrsqrt.f32 %v535_v8 }
 0x3b9   :  { %v913_v10 = vpop.eup %912 }
 0x3ba   :  { %v537_v12 = vmul.f32 %v913_v10, %v533_v43  ;;  %v538_v16 = vmul.f32 %v913_v10, %v534_v47 }
 0x3bc   :  { %v547_v17 = vadd.f32 %v738_v11, %v537_v12  ;;  %v548_v18 = vadd.f32 %v738_v11, %v538_v16 }
 0x3be   :  { %v549_v3 = vadd.f32 %v547_v17, %v1092_v13  ;;  %v550_v4 = vadd.f32 %v548_v18, %v1095_v14 }
 0x3c0   :  { %v551_v15 = vadd.f32 %v550_v4, %v549_v3 }
 0x3c2   :  { %v552_v19 = vrot.slane %v551_v15, 4 }
 0x3c4   :  { %v553_v20 = vadd.f32 %v552_v19, %v551_v15 }
 0x3c6   :  { %v554_v21 = vrot.slane %v553_v20, 2 }
 0x3c8   :  { %v555_v22 = vadd.f32 %v554_v21, %v553_v20 }
 0x3ca   :  { %v556_v23 = vrot.slane %v555_v22, 1 }
 0x3cc   :  { %v557_v24 = vadd.f32 %v556_v23, %v555_v22 }
 0x3ce   :  { %v558_v25 = vmul.f32 0.0625, %v557_v24 }
 0x3d0   :  { %v559_v26 = vpack.c.bf16 %v558_v25, %v558_v25 }
 0x3d2   :  { %873 = vmatmul.mubr.bf16.vlgmr.msra.gmra.mxu1 %v559_v26 }
 0x492   :  { %v659_v28 = vpop.f32.mrf.mxu1 }
 0x493   :  { %v660_v13 = vadd.f32 %v659_v28, %v576_v27 }
 0x494   :  { %v874_v14 = vpop.f32.mrf.mxu1 }
 0x495   :  { %665 = vst [vmem:[#allocation3] sm:$0x1] %v660_v13 }
 0x496   :  { %v662_v29 = vpop.f32.mrf.mxu1 }
 0x497   :  { %925 = shalt.err (!%p922_p4)
}
 0x498   :  { %675 = dma.vmem_to_hbm [thread:$0]  %s673_s19, 16, %s1200_s10, [#allocation4]   ;;  %v875_v30 = vpop.f32.mrf.mxu1 }
 0x499   :  { %934 = dma.done.wait [#allocation4], 16  }
 0x49a   :  { %935 = vsyncadd [#allocation4], 4294967280 }
 0x49b   :  { %679 = vsyncpa [#allocation4], 1 }

</bundles_post_ra>
